<compile_context>
chip_gen: v7x
topology: tpu7x:2x2x1
jax: 0.10.0
libtpu: 0.0.40
codegen_flags: <defaults>
</compile_context>

<pallas_src>
import jax
import jax.numpy as jnp
import numpy as np
from jax.experimental import pallas as pl
from jax.experimental.pallas import tpu as pltpu


# ----------------------------------------------------------------------------
# small helpers
# ----------------------------------------------------------------------------
def _round_up(x, m):
    return (x + m - 1) // m * m


def _weight_norm(v, g):
    # torch weight_norm, dim=0: norm over (in_ch, tap) per output channel.
    nrm = jnp.sqrt(jnp.sum(v * v, axis=(1, 2), keepdims=True))
    return g * v / nrm


def _im2col_weight(w, K, c_in, Pi, c_out, Po):
    # w: (c_out, c_in, K) f32  ->  (K*Pi, Po) bf16 with zero-padded channels.
    # Row index k*Pi + c holds w[o, c, k], matching the kernel's im2col operand.
    wk = jnp.transpose(w, (2, 1, 0))                       # (K, c_in, c_out)
    wk = jnp.pad(wk, ((0, 0), (0, Pi - c_in), (0, Po - c_out)))
    return wk.reshape(K * Pi, Po).astype(jnp.bfloat16)


def _pad_bias(b, Po):
    return jnp.pad(b, (0, Po - b.shape[0])).reshape(1, Po).astype(jnp.float32)


def _pick_time_tile(L, pad, hint):
    # A valid tile TL must: cover the causal history (TL >= pad), divide L, and
    # be sublane-aligned (TL % 8 == 0) or equal L.
    cands = ([] if hint is None else [hint]) + [512, 256, 128]
    for cand in cands:
        cand = min(cand, L)
        if cand >= pad and L % cand == 0 and (cand % 8 == 0 or cand == L):
            return cand
    return L  # fallback: whole sequence in one tile


# ----------------------------------------------------------------------------
# Pallas kernel: one TemporalBlock, one (batch-tile, time-tile) grid step.
# ----------------------------------------------------------------------------
def _make_block_kernel(*, K, dilation, pad, Nb, TL, Pi, Po, has_down):
    d = dilation

    def kernel(x_ref, w1_ref, b1_ref, w2_ref, b2_ref, *rest):
        # x_ref:  (Nb, TL, Pi) bf16        current time tile (channel padded)
        # w1_ref: (K*Pi, Po)  bf16  b1_ref: (1, Po) f32
        # w2_ref: (K*Po, Po)  bf16  b2_ref: (1, Po) f32
        # [wd_ref: (Pi, Po) bf16, bd_ref: (1, Po) f32]     (only if downsample)
        # out_ref: (Nb, TL, Po) bf16
        # xext_ref:  (Nb, TL+pad, Pi) bf16  persistent: [causal history | tile]
        # h1ext_ref: (Nb, TL+pad, Po) bf16  persistent: same for conv1 output
        if has_down:
            wd_ref, bd_ref, out_ref, xext_ref, h1ext_ref = rest
        else:
            out_ref, xext_ref, h1ext_ref = rest

        t = pl.program_id(1)
        n_t = pl.num_programs(1)

        # Zero the causal history once per batch tile (time index resets to 0).
        if pad > 0:
            @pl.when(t == 0)
            def _init():
                xext_ref[:, :pad, :] = jnp.zeros((Nb, pad, Pi), jnp.bfloat16)
                h1ext_ref[:, :pad, :] = jnp.zeros((Nb, pad, Po), jnp.bfloat16)

        # Stage the current tile after the history rows.
        xext_ref[:, pad:, :] = x_ref[...]
        xext = xext_ref[...]                                # (Nb, TL+pad, Pi)

        # ---- conv1 (dilated causal): im2col -> one MXU matmul ---------------
        a1 = jnp.concatenate(
            [xext[:, k * d:k * d + TL, :] for k in range(K)], axis=-1)
        a1 = a1.reshape(Nb * TL, K * Pi)                    # bf16
        h1 = jnp.dot(a1, w1_ref[...], preferred_element_type=jnp.float32)
        h1 = jnp.maximum(h1 + b1_ref[...], 0.0)             # bias + ReLU (f32)
        # dropout1: identity (eval)

        # ---- conv2 (dilated causal) on h1 -----------------------------------
        h1ext_ref[:, pad:, :] = h1.reshape(Nb, TL, Po).astype(jnp.bfloat16)
        h1e = h1ext_ref[...]                                # (Nb, TL+pad, Po)
        a2 = jnp.concatenate(
            [h1e[:, k * d:k * d + TL, :] for k in range(K)], axis=-1)
        a2 = a2.reshape(Nb * TL, K * Po)
        h2 = jnp.dot(a2, w2_ref[...], preferred_element_type=jnp.float32)
        h2 = jnp.maximum(h2 + b2_ref[...], 0.0)
        # dropout2: identity (eval)

        # ---- residual branch + final ReLU (f32 elementwise) -----------------
        x_cur = xext[:, pad:, :].reshape(Nb * TL, Pi)
        if has_down:
            res = jnp.dot(x_cur, wd_ref[...],
                          preferred_element_type=jnp.float32) + bd_ref[...]
        else:
            res = x_cur.astype(jnp.float32)
        out = jnp.maximum(h2 + res, 0.0)
        out_ref[...] = out.reshape(Nb, TL, Po).astype(out_ref.dtype)

        # Carry the last `pad` rows of x and h1 to the next time tile.
        if pad > 0:
            @pl.when(t + 1 < n_t)
            def _carry():
                xext_ref[:, :pad, :] = xext_ref[:, TL:TL + pad, :]
                h1ext_ref[:, :pad, :] = h1ext_ref[:, TL:TL + pad, :]

    return kernel


# ----------------------------------------------------------------------------
# One TemporalBlock on channel-padded NLC bf16 activations.
# ----------------------------------------------------------------------------
def _temporal_block_padded(x_nlc, blk, *, kernel_size, dilation,
                           batch_tile=None, time_tile=None):
    """x_nlc: (N, L, Pi) bf16, channel-padded.  Returns (N, L, Po) bf16."""
    N, L, Pi = x_nlc.shape
    K = kernel_size
    pad = (K - 1) * dilation
    C_in, C_out = blk["c_in"], blk["c_out"]
    Po = _round_up(C_out, 128)
    assert Pi == _round_up(C_in, 128)
    has_down = C_in != C_out

    # Tiling: all batch rows in one tile by default; time tiled with causal
    # history carry (bounds VMEM independently of L; sized for v7x 64 MiB).
    Nb = N if batch_tile is None else min(batch_tile, N)
    if N % Nb != 0:
        Nb = N
    TL = _pick_time_tile(L, pad, time_tile)
    grid = (N // Nb, L // TL)

    # Glue: weight norm (f32) -> im2col weights (bf16), padded biases (f32).
    w1 = _weight_norm(blk["v1"], blk["g1"])                # (C_out, C_in, K)
    w2 = _weight_norm(blk["v2"], blk["g2"])                # (C_out, C_out, K)
    w1_im = _im2col_weight(w1, K, C_in, Pi, C_out, Po)     # (K*Pi, Po) bf16
    w2_im = _im2col_weight(w2, K, C_out, Po, C_out, Po)    # (K*Po, Po) bf16
    b1 = _pad_bias(blk["b1"], Po)
    b2 = _pad_bias(blk["b2"], Po)

    args = [x_nlc, w1_im, b1, w2_im, b2]
    in_specs = [
        pl.BlockSpec((Nb, TL, Pi), lambda b, t: (b, t, 0)),
        pl.BlockSpec((K * Pi, Po), lambda b, t: (0, 0)),
        pl.BlockSpec((1, Po), lambda b, t: (0, 0)),
        pl.BlockSpec((K * Po, Po), lambda b, t: (0, 0)),
        pl.BlockSpec((1, Po), lambda b, t: (0, 0)),
    ]
    if has_down:
        wd = jnp.pad(jnp.transpose(blk["wd"][:, :, 0], (1, 0)),
                     ((0, Pi - C_in), (0, Po - C_out))).astype(jnp.bfloat16)
        bd = _pad_bias(blk["bd"], Po)
        args += [wd, bd]
        in_specs += [pl.BlockSpec((Pi, Po), lambda b, t: (0, 0)),
                     pl.BlockSpec((1, Po), lambda b, t: (0, 0))]

    kernel = _make_block_kernel(K=K, dilation=dilation, pad=pad, Nb=Nb, TL=TL,
                                Pi=Pi, Po=Po, has_down=has_down)

    out = pl.pallas_call(
        kernel,
        out_shape=jax.ShapeDtypeStruct((N, L, Po), jnp.bfloat16),
        grid_spec=pltpu.PrefetchScalarGridSpec(
            num_scalar_prefetch=0,
            grid=grid,
            in_specs=in_specs,
            out_specs=pl.BlockSpec((Nb, TL, Po), lambda b, t: (b, t, 0)),
            scratch_shapes=[
                pltpu.VMEM((Nb, TL + pad, Pi), jnp.bfloat16),
                pltpu.VMEM((Nb, TL + pad, Po), jnp.bfloat16),
            ],
        ),
        compiler_params=pltpu.CompilerParams(
            dimension_semantics=("parallel", "arbitrary")),
    )(*args)
    return out


# ----------------------------------------------------------------------------
# Full TemporalConvNet forward (PyTorch NCL in / NCL out).
# ----------------------------------------------------------------------------
def temporal_conv_net_forward(x, params_list, *, kernel_size,
                              batch_tile=None, time_tile=None):
    """x: (N, C0, L) f32 NCL.  Returns (N, num_channels[-1], L) f32."""
    N, C0, L = x.shape
    P0 = _round_up(C0, 128)
    # Single layout change for the whole network: NCL -> NLC, channel pad, bf16.
    h = jnp.transpose(x, (0, 2, 1)).astype(jnp.float32)
    h = jnp.pad(h, ((0, 0), (0, 0), (0, P0 - C0))).astype(jnp.bfloat16)
    for i, blk in enumerate(params_list):
        h = _temporal_block_padded(h, blk, kernel_size=kernel_size,
                                   dilation=2 ** i,
                                   batch_tile=batch_tile, time_tile=time_tile)
    C_last = params_list[-1]["c_out"]
    out = h[:, :, :C_last].astype(jnp.float32)
    return jnp.transpose(out, (0, 2, 1))


# ----------------------------------------------------------------------------
# Pure-JAX reference.  Mirrors the kernel's bf16 operand rounding (the only
# intentional deviation from f32 PyTorch math) so the check can be tight.
# ----------------------------------------------------------------------------
def reference_forward(x, params_list, *, kernel_size):
    K = kernel_size
    f32 = jnp.float32
    hp = jax.lax.Precision.HIGHEST

    def bf16_round(a):
        return a.astype(jnp.bfloat16).astype(f32)

    h = x.astype(f32)
    for i, blk in enumerate(params_list):
        d = 2 ** i
        pad = (K - 1) * d
        N, _, L = h.shape
        w1 = bf16_round(_weight_norm(blk["v1"], blk["g1"]))
        w2 = bf16_round(_weight_norm(blk["v2"], blk["g2"]))
        hb = bf16_round(h)

        def cconv(xx, w, b):
            xp = jnp.pad(xx, ((0, 0), (0, 0), (pad, 0)))
            out = jnp.zeros((N, w.shape[0], L), f32)
            for k in range(K):
                out = out + jnp.einsum("ncl,oc->nol",
                                       xp[:, :, k * d:k * d + L], w[:, :, k],
                                       precision=hp)
            return out + b[None, :, None]

        h1 = jax.nn.relu(cconv(hb, w1, blk["b1"]))
        h1 = bf16_round(h1)                       # kernel stores h1 as bf16
        h2 = jax.nn.relu(cconv(h1, w2, blk["b2"]))
        if blk["c_in"] != blk["c_out"]:
            wd = bf16_round(blk["wd"][:, :, 0])
            res = jnp.einsum("ncl,oc->nol", hb, wd, precision=hp) \
                + blk["bd"][None, :, None]
        else:
            res = hb
        h = bf16_round(jax.nn.relu(h2 + res))     # kernel output dtype is bf16
    return h


# ----------------------------------------------------------------------------
def init_tcn_params(key, num_inputs, num_channels, kernel_size):
    params_list = []
    c_in = num_inputs
    for c_out in num_channels:
        key, k1, k2, k3, k4, k5, k6 = jax.random.split(key, 7)

        def kaiming(k, shape):
            fan_in = shape[1] * shape[2]
            return jax.random.normal(k, shape, jnp.float32) * jnp.sqrt(2.0 / fan_in)

        v1 = kaiming(k1, (c_out, c_in, kernel_size))
        v2 = kaiming(k2, (c_out, c_out, kernel_size))
        blk = {
            "c_in": c_in, "c_out": c_out,
            "v1": v1,
            "g1": jnp.sqrt(jnp.sum(v1 * v1, axis=(1, 2), keepdims=True)),
            "b1": jax.random.normal(k3, (c_out,), jnp.float32) * 0.05,
            "v2": v2,
            "g2": jnp.sqrt(jnp.sum(v2 * v2, axis=(1, 2), keepdims=True)),
            "b2": jax.random.normal(k4, (c_out,), jnp.float32) * 0.05,
        }
        if c_in != c_out:
            blk["wd"] = kaiming(k5, (c_out, c_in, 1))
            blk["bd"] = jax.random.normal(k6, (c_out,), jnp.float32) * 0.05
        params_list.append(blk)
        c_in = c_out
    return params_list


if __name__ == "__main__":
    # Small TCN: num_inputs=4, num_channels=(8, 8, 16), kernel_size=3,
    # dilations 1/2/4, padding (K-1)*dilation, dropout=0.2 (identity in eval).
    # time_tile=16 exercises the multi-time-tile causal history carry.
    N, C_IN, L = 2, 4, 32
    NUM_CHANNELS = (8, 8, 16)
    KSIZE = 3

    key = jax.random.PRNGKey(0)
    k_x, k_p = jax.random.split(key)
    x = jax.random.normal(k_x, (N, C_IN, L), jnp.float32)
    params_list = init_tcn_params(k_p, C_IN, NUM_CHANNELS, KSIZE)

    out = temporal_conv_net_forward(x, params_list, kernel_size=KSIZE,
                                    time_tile=16)
    out = jax.block_until_ready(out)

    ref = reference_forward(x, params_list, kernel_size=KSIZE)
    assert out.shape == (N, NUM_CHANNELS[-1], L)
    np.testing.assert_allclose(np.asarray(out), np.asarray(ref),
                               rtol=2e-2, atol=2e-2)
    print("KERNEL_OK")
</pallas_src>

<mosaic_0001>
module attributes {stable_mosaic.version = 11 : i64} {
  func.func @kernel(%arg0: i32, %arg1: i32, %arg2: memref<2x16x128xbf16, #tpu.memory_space<vmem>>, %arg3: memref<384x128xbf16, #tpu.memory_space<vmem>>, %arg4: memref<1x128xf32, #tpu.memory_space<vmem>>, %arg5: memref<384x128xbf16, #tpu.memory_space<vmem>>, %arg6: memref<1x128xf32, #tpu.memory_space<vmem>>, %arg7: memref<128x128xbf16, #tpu.memory_space<vmem>>, %arg8: memref<1x128xf32, #tpu.memory_space<vmem>>, %arg9: memref<2x16x128xbf16, #tpu.memory_space<vmem>>, %arg10: memref<2x18x128xbf16, #tpu.memory_space<vmem>>, %arg11: memref<2x18x128xbf16, #tpu.memory_space<vmem>>) attributes {dimension_semantics = [#tpu.dimension_semantics<parallel>, #tpu.dimension_semantics<arbitrary>], iteration_bounds = array<i64: 1, 2>, scalar_prefetch = 0 : i64, scratch_operands = 2 : i64, tpu.core_type = #tpu.core_type<tc>, window_params = [{transform_indices = @transform_0, window_bounds = array<i64: 2, 16, 128>}, {pipeline_mode = #tpu.pipeline_mode<synchronous>, transform_indices = @transform_1, window_bounds = array<i64: 384, 128>}, {pipeline_mode = #tpu.pipeline_mode<synchronous>, transform_indices = @transform_2, window_bounds = array<i64: 1, 128>}, {pipeline_mode = #tpu.pipeline_mode<synchronous>, transform_indices = @transform_3, window_bounds = array<i64: 384, 128>}, {pipeline_mode = #tpu.pipeline_mode<synchronous>, transform_indices = @transform_4, window_bounds = array<i64: 1, 128>}, {pipeline_mode = #tpu.pipeline_mode<synchronous>, transform_indices = @transform_5, window_bounds = array<i64: 128, 128>}, {pipeline_mode = #tpu.pipeline_mode<synchronous>, transform_indices = @transform_6, window_bounds = array<i64: 1, 128>}, {transform_indices = @transform_7, window_bounds = array<i64: 2, 16, 128>}]} {
    %c0_i32 = arith.constant 0 : i32
    %0 = arith.cmpi eq, %arg1, %c0_i32 : i32
    %1 = arith.extui %0 : i1 to i32
    %c0_i32_0 = arith.constant 0 : i32
    %2 = arith.cmpi ne, %1, %c0_i32_0 : i32
    scf.if %2 {
      %cst_35 = arith.constant 0.000000e+00 : bf16
      %51 = vector.broadcast %cst_35 : bf16 to vector<2x2x128xbf16>
      %c0_36 = arith.constant 0 : index
      %c0_37 = arith.constant 0 : index
      %c0_38 = arith.constant 0 : index
      %52 = vector.load %arg10[%c0_36, %c0_37, %c0_38] : memref<2x18x128xbf16, #tpu.memory_space<vmem>>, vector<2x2x128xbf16>
      tpu.vector_store %arg10[%c0_36, %c0_37, %c0_38], %51 {strides = array<i32>} : memref<2x18x128xbf16, #tpu.memory_space<vmem>>, vector<2x2x128xbf16>,
      %cst_39 = arith.constant 0.000000e+00 : bf16
      %53 = vector.broadcast %cst_39 : bf16 to vector<2x2x128xbf16>
      %c0_40 = arith.constant 0 : index
      %c0_41 = arith.constant 0 : index
      %c0_42 = arith.constant 0 : index
      %54 = vector.load %arg11[%c0_40, %c0_41, %c0_42] : memref<2x18x128xbf16, #tpu.memory_space<vmem>>, vector<2x2x128xbf16>
      tpu.vector_store %arg11[%c0_40, %c0_41, %c0_42], %53 {strides = array<i32>} : memref<2x18x128xbf16, #tpu.memory_space<vmem>>, vector<2x2x128xbf16>,
    } else {
    }
    %c0 = arith.constant 0 : index
    %c0_1 = arith.constant 0 : index
    %c0_2 = arith.constant 0 : index
    %3 = vector.load %arg2[%c0, %c0_1, %c0_2] : memref<2x16x128xbf16, #tpu.memory_space<vmem>>, vector<2x16x128xbf16>
    %c0_3 = arith.constant 0 : index
    %c2 = arith.constant 2 : index
    %c0_4 = arith.constant 0 : index
    %4 = vector.load %arg10[%c0_3, %c2, %c0_4] : memref<2x18x128xbf16, #tpu.memory_space<vmem>>, vector<2x16x128xbf16>
    tpu.vector_store %arg10[%c0_3, %c2, %c0_4], %3 {strides = array<i32>} : memref<2x18x128xbf16, #tpu.memory_space<vmem>>, vector<2x16x128xbf16>,
    %c0_5 = arith.constant 0 : index
    %c0_6 = arith.constant 0 : index
    %c0_7 = arith.constant 0 : index
    %5 = vector.load %arg10[%c0_5, %c0_6, %c0_7] : memref<2x18x128xbf16, #tpu.memory_space<vmem>>, vector<2x18x128xbf16>
    %6 = vector.extract_strided_slice %5 {offsets = [0, 0, 0], sizes = [2, 16, 128], strides = [1, 1, 1]} : vector<2x18x128xbf16> to vector<2x16x128xbf16>
    %7 = vector.extract_strided_slice %5 {offsets = [0, 1, 0], sizes = [2, 16, 128], strides = [1, 1, 1]} : vector<2x18x128xbf16> to vector<2x16x128xbf16>
    %8 = vector.extract_strided_slice %5 {offsets = [0, 2, 0], sizes = [2, 16, 128], strides = [1, 1, 1]} : vector<2x18x128xbf16> to vector<2x16x128xbf16>
    %9 = tpu.concatenate %6, %7, %8 in 2 : vector<2x16x128xbf16>, vector<2x16x128xbf16>, vector<2x16x128xbf16> -> vector<2x16x384xbf16>
    %10 = vector.shape_cast %9 : vector<2x16x384xbf16> to vector<32x384xbf16>
    %c0_8 = arith.constant 0 : index
    %c0_9 = arith.constant 0 : index
    %11 = vector.load %arg3[%c0_8, %c0_9] : memref<384x128xbf16, #tpu.memory_space<vmem>>, vector<384x128xbf16>
    %cst = arith.constant dense<0.000000e+00> : vector<32x128xf32>
    %12 = tpu.matmul %10, %11, %cst {dimension_numbers = #tpu.dot_dimension_numbers<[1], [0], [0], [1], [0, 0, 1, 1], [], []>} : vector<32x384xbf16>, vector<384x128xbf16>, vector<32x128xf32> -> vector<32x128xf32>
    %c0_10 = arith.constant 0 : index
    %c0_11 = arith.constant 0 : index
    %13 = vector.load %arg4[%c0_10, %c0_11] : memref<1x128xf32, #tpu.memory_space<vmem>>, vector<1x128xf32>
    %14 = vector.broadcast %13 : vector<1x128xf32> to vector<32x128xf32>
    %15 = arith.addf %12, %14 : vector<32x128xf32>
    %cst_12 = arith.constant 0.000000e+00 : f32
    %16 = vector.broadcast %cst_12 : f32 to vector<32x128xf32>
    %17 = arith.maximumf %15, %16 : vector<32x128xf32>
    %18 = vector.shape_cast %17 : vector<32x128xf32> to vector<2x16x128xf32>
    %19 = arith.truncf %18 : vector<2x16x128xf32> to vector<2x16x128xbf16>
    %c0_13 = arith.constant 0 : index
    %c2_14 = arith.constant 2 : index
    %c0_15 = arith.constant 0 : index
    %20 = vector.load %arg11[%c0_13, %c2_14, %c0_15] : memref<2x18x128xbf16, #tpu.memory_space<vmem>>, vector<2x16x128xbf16>
    tpu.vector_store %arg11[%c0_13, %c2_14, %c0_15], %19 {strides = array<i32>} : memref<2x18x128xbf16, #tpu.memory_space<vmem>>, vector<2x16x128xbf16>,
    %c0_16 = arith.constant 0 : index
    %c0_17 = arith.constant 0 : index
    %c0_18 = arith.constant 0 : index
    %21 = vector.load %arg11[%c0_16, %c0_17, %c0_18] : memref<2x18x128xbf16, #tpu.memory_space<vmem>>, vector<2x18x128xbf16>
    %22 = vector.extract_strided_slice %21 {offsets = [0, 0, 0], sizes = [2, 16, 128], strides = [1, 1, 1]} : vector<2x18x128xbf16> to vector<2x16x128xbf16>
    %23 = vector.extract_strided_slice %21 {offsets = [0, 1, 0], sizes = [2, 16, 128], strides = [1, 1, 1]} : vector<2x18x128xbf16> to vector<2x16x128xbf16>
    %24 = vector.extract_strided_slice %21 {offsets = [0, 2, 0], sizes = [2, 16, 128], strides = [1, 1, 1]} : vector<2x18x128xbf16> to vector<2x16x128xbf16>
    %25 = tpu.concatenate %22, %23, %24 in 2 : vector<2x16x128xbf16>, vector<2x16x128xbf16>, vector<2x16x128xbf16> -> vector<2x16x384xbf16>
    %26 = vector.shape_cast %25 : vector<2x16x384xbf16> to vector<32x384xbf16>
    %c0_19 = arith.constant 0 : index
    %c0_20 = arith.constant 0 : index
    %27 = vector.load %arg5[%c0_19, %c0_20] : memref<384x128xbf16, #tpu.memory_space<vmem>>, vector<384x128xbf16>
    %cst_21 = arith.constant dense<0.000000e+00> : vector<32x128xf32>
    %28 = tpu.matmul %26, %27, %cst_21 {dimension_numbers = #tpu.dot_dimension_numbers<[1], [0], [0], [1], [0, 0, 1, 1], [], []>} : vector<32x384xbf16>, vector<384x128xbf16>, vector<32x128xf32> -> vector<32x128xf32>
    %c0_22 = arith.constant 0 : index
    %c0_23 = arith.constant 0 : index
    %29 = vector.load %arg6[%c0_22, %c0_23] : memref<1x128xf32, #tpu.memory_space<vmem>>, vector<1x128xf32>
    %30 = vector.broadcast %29 : vector<1x128xf32> to vector<32x128xf32>
    %31 = arith.addf %28, %30 : vector<32x128xf32>
    %cst_24 = arith.constant 0.000000e+00 : f32
    %32 = vector.broadcast %cst_24 : f32 to vector<32x128xf32>
    %33 = arith.maximumf %31, %32 : vector<32x128xf32>
    %34 = vector.extract_strided_slice %5 {offsets = [0, 2, 0], sizes = [2, 16, 128], strides = [1, 1, 1]} : vector<2x18x128xbf16> to vector<2x16x128xbf16>
    %35 = vector.shape_cast %34 : vector<2x16x128xbf16> to vector<32x128xbf16>
    %c0_25 = arith.constant 0 : index
    %c0_26 = arith.constant 0 : index
    %36 = vector.load %arg7[%c0_25, %c0_26] : memref<128x128xbf16, #tpu.memory_space<vmem>>, vector<128x128xbf16>
    %cst_27 = arith.constant dense<0.000000e+00> : vector<32x128xf32>
    %37 = tpu.matmul %35, %36, %cst_27 {dimension_numbers = #tpu.dot_dimension_numbers<[1], [0], [0], [1], [0, 0, 1, 1], [], []>} : vector<32x128xbf16>, vector<128x128xbf16>, vector<32x128xf32> -> vector<32x128xf32>
    %c0_28 = arith.constant 0 : index
    %c0_29 = arith.constant 0 : index
    %38 = vector.load %arg8[%c0_28, %c0_29] : memref<1x128xf32, #tpu.memory_space<vmem>>, vector<1x128xf32>
    %39 = vector.broadcast %38 : vector<1x128xf32> to vector<32x128xf32>
    %40 = arith.addf %37, %39 : vector<32x128xf32>
    %41 = arith.addf %33, %40 : vector<32x128xf32>
    %cst_30 = arith.constant 0.000000e+00 : f32
    %42 = vector.broadcast %cst_30 : f32 to vector<32x128xf32>
    %43 = arith.maximumf %41, %42 : vector<32x128xf32>
    %44 = vector.shape_cast %43 : vector<32x128xf32> to vector<2x16x128xf32>
    %45 = arith.truncf %44 : vector<2x16x128xf32> to vector<2x16x128xbf16>
    %c0_31 = arith.constant 0 : index
    %c0_32 = arith.constant 0 : index
    %c0_33 = arith.constant 0 : index
    %46 = vector.load %arg9[%c0_31, %c0_32, %c0_33] : memref<2x16x128xbf16, #tpu.memory_space<vmem>>, vector<2x16x128xbf16>
    tpu.vector_store %arg9[%c0_31, %c0_32, %c0_33], %45 {strides = array<i32>} : memref<2x16x128xbf16, #tpu.memory_space<vmem>>, vector<2x16x128xbf16>,
    %c1_i32 = arith.constant 1 : i32
    %47 = arith.addi %arg1, %c1_i32 : i32
    %c2_i32 = arith.constant 2 : i32
    %48 = arith.cmpi slt, %47, %c2_i32 : i32
    %49 = arith.extui %48 : i1 to i32
    %c0_i32_34 = arith.constant 0 : i32
    %50 = arith.cmpi ne, %49, %c0_i32_34 : i32
    scf.if %50 {
      %c0_35 = arith.constant 0 : index
      %c16 = arith.constant 16 : index
      %c0_36 = arith.constant 0 : index
      %51 = vector.load %arg10[%c0_35, %c16, %c0_36] : memref<2x18x128xbf16, #tpu.memory_space<vmem>>, vector<2x2x128xbf16>
      %c0_37 = arith.constant 0 : index
      %c0_38 = arith.constant 0 : index
      %c0_39 = arith.constant 0 : index
      %52 = vector.load %arg10[%c0_37, %c0_38, %c0_39] : memref<2x18x128xbf16, #tpu.memory_space<vmem>>, vector<2x2x128xbf16>
      tpu.vector_store %arg10[%c0_37, %c0_38, %c0_39], %51 {strides = array<i32>} : memref<2x18x128xbf16, #tpu.memory_space<vmem>>, vector<2x2x128xbf16>,
      %c0_40 = arith.constant 0 : index
      %c16_41 = arith.constant 16 : index
      %c0_42 = arith.constant 0 : index
      %53 = vector.load %arg11[%c0_40, %c16_41, %c0_42] : memref<2x18x128xbf16, #tpu.memory_space<vmem>>, vector<2x2x128xbf16>
      %c0_43 = arith.constant 0 : index
      %c0_44 = arith.constant 0 : index
      %c0_45 = arith.constant 0 : index
      %54 = vector.load %arg11[%c0_43, %c0_44, %c0_45] : memref<2x18x128xbf16, #tpu.memory_space<vmem>>, vector<2x2x128xbf16>
      tpu.vector_store %arg11[%c0_43, %c0_44, %c0_45], %53 {strides = array<i32>} : memref<2x18x128xbf16, #tpu.memory_space<vmem>>, vector<2x2x128xbf16>,
    } else {
    }
    return
  }
  func.func @transform_0(%arg0: i32, %arg1: i32) -> (i32, i32, i32) {
    %c0_i32 = arith.constant 0 : i32
    %c0_i32_0 = arith.constant 0 : i32
    return %arg0, %arg1, %c0_i32 : i32, i32, i32
  }
  func.func @transform_1(%arg0: i32, %arg1: i32) -> (i32, i32) {
    %c0_i32 = arith.constant 0 : i32
    %c0_i32_0 = arith.constant 0 : i32
    %c0_i32_1 = arith.constant 0 : i32
    return %c0_i32, %c0_i32_0 : i32, i32
  }
  func.func @transform_2(%arg0: i32, %arg1: i32) -> (i32, i32) {
    %c0_i32 = arith.constant 0 : i32
    %c0_i32_0 = arith.constant 0 : i32
    %c0_i32_1 = arith.constant 0 : i32
    return %c0_i32, %c0_i32_0 : i32, i32
  }
  func.func @transform_3(%arg0: i32, %arg1: i32) -> (i32, i32) {
    %c0_i32 = arith.constant 0 : i32
    %c0_i32_0 = arith.constant 0 : i32
    %c0_i32_1 = arith.constant 0 : i32
    return %c0_i32, %c0_i32_0 : i32, i32
  }
  func.func @transform_4(%arg0: i32, %arg1: i32) -> (i32, i32) {
    %c0_i32 = arith.constant 0 : i32
    %c0_i32_0 = arith.constant 0 : i32
    %c0_i32_1 = arith.constant 0 : i32
    return %c0_i32, %c0_i32_0 : i32, i32
  }
  func.func @transform_5(%arg0: i32, %arg1: i32) -> (i32, i32) {
    %c0_i32 = arith.constant 0 : i32
    %c0_i32_0 = arith.constant 0 : i32
    %c0_i32_1 = arith.constant 0 : i32
    return %c0_i32, %c0_i32_0 : i32, i32
  }
  func.func @transform_6(%arg0: i32, %arg1: i32) -> (i32, i32) {
    %c0_i32 = arith.constant 0 : i32
    %c0_i32_0 = arith.constant 0 : i32
    %c0_i32_1 = arith.constant 0 : i32
    return %c0_i32, %c0_i32_0 : i32, i32
  }
  func.func @transform_7(%arg0: i32, %arg1: i32) -> (i32, i32, i32) {
    %c0_i32 = arith.constant 0 : i32
    %c0_i32_0 = arith.constant 0 : i32
    return %arg0, %arg1, %c0_i32 : i32, i32, i32
  }
}

</mosaic_0001>

<bundles_post_ra>
// kernel: tpu_custom_call.1
= control target key start
LH: loop header
LB: loop body
LE: loop exit
PB: predicated region body
PF: predicated region fallthrough
CT: control target
= control target key end

     0   :  { %s2545_s0 = inlined_call_operand.hbm [shape: bf16[2,32,128], index: 0, kind: input, shape index: {}]   ;;  %s2546_s1 = inlined_call_operand.hbm [shape: bf16[384,128], index: 1, kind: input, shape index: {}]   ;;  %s2547_s2 = inlined_call_operand.vmem [shape: f32[1,128], index: 2, kind: input, shape index: {}]   ;;  %s2548_s3 = inlined_call_operand.hbm [shape: bf16[384,128], index: 3, kind: input, shape index: {}]   ;;  %s2549_s4 = inlined_call_operand.vmem [shape: f32[1,128], index: 4, kind: input, shape index: {}]   ;;  %s2550_s5 = inlined_call_operand.hbm [shape: bf16[128,128], index: 5, kind: input, shape index: {}]   ;;  %s2551_s6 = inlined_call_operand.vmem [shape: f32[1,128], index: 6, kind: input, shape index: {}]   ;;  %s2552_s7 = inlined_call_operand.hbm [shape: bf16[2,32,128], index: 7, kind: output, shape index: {}]  }
   0x1   :  { %2562 = sst [smem:[#allocation27_spill]] %s2551_s6 }
   0x2   :  { %2563 = sst [smem:[#allocation28_spill]] %s2552_s7 }
   0x3   :  { %12 = vsyncpa [#allocation5], 0 }
   0x4   :  { %14 = vsyncpa [#allocation5 + $0x1], 0 }
   0x5   :  { %15 = vsyncpa [#allocation8], 0 }
   0x6   :  { %16 = vsyncpa [#allocation11], 0 }
   0x7   :  { %17 = vsyncpa [#allocation6], 0 }
   0x8   :  { %19 = vsyncpa [#allocation6 + $0x1], 0  ;;  %s2192_s24 = smov 0   ;;  %s2194_s25 = smov 0  }
   0x9   :  { %s2196_s26 = smov 0   ;;  %s2198_s27 = smov 0  }
   0xa   :  { %s2200_s28 = smov 0   ;;  %s2202_s29 = smov 0  }
   0xb LB: > { %2564 = sst [smem:[#allocation22_spill]] %s2111_s24  ;;  %s1533_s30 = sadd.s32 4294967295, %s2131_s29   ;;  %s2131_s29 = sphi %s2202_s29, %s25_s29   ;;  %s2127_s28 = sphi %s2200_s28, %s2596_s28   ;;  %s2123_s27 = sphi %s2198_s27, %s2595_s27   ;;  %s2119_s26 = sphi %s2196_s26, %s2594_s26   ;;  %s2115_s25 = sphi %s2194_s25, %s2593_s25   ;;  %s2111_s24 = sphi %s2192_s24, %s2592_s24  }
   0xc   : > { %s1534_s8 = sadd.s32 4294967294, %s2131_s29   ;;  %s34_s9 = sadd.s32 1, %s2127_s28 }
   0xd   : > { %s46_s10 = sadd.s32 1, %s2119_s26  ;;  %p35_p0 = scmp.ge.s32.totalorder %s34_s9, 2 }
   0xe   : > { %p53_p1 = scmp.ne.s32.totalorder %s2119_s26, %s2115_s25  ;;  %p54_p2 = scmp.eq.s32.totalorder %s2131_s29, 0 }
   0xf   : > { %p59_p3 = scmp.ne.s32.totalorder %s2115_s25, %s2111_s24  ;;  %s2598_s9 = smov (%p35_p0, %s34_s9), 0 }
  0x10   : > { %2565 = sst [smem:[#allocation23_spill]] %s2598_s9  ;;  %p2233_p4 = por %p54_p2, %p53_p1 }
  0x11   : > { %p2237_p5 = scmp.eq.s32.totalorder %s1533_s30, 0  ;;  %s42_s13 = ssub.s32 %s2127_s28, %s2598_s9 }
  0x12   : > { %p211_p6 = scmp.eq.s32.totalorder %s1533_s30, 1  ;;  %p44_p7 = scmp.eq.s32.totalorder %s42_s13, 0 }
  0x13   : > { %s2567_s12 = scalar_select %p2237_p5, 1, 0 }
  0x14   : > { %p2245_p8 = por %p2237_p5, %p59_p3  ;;  %p2249_p9 = por %p211_p6, %p53_p1 }
  0x15   : > { %p217_p10 = scmp.eq.s32.totalorder %s1534_s8, 1  ;;  %p1535_p12 = scmp.ge.s32.totalorder %s2131_s29, 1 }
  0x16   : > { %s2568_s14 = scalar_select %p2245_p8, 1, 0 }
  0x17   : > { %s2569_s15 = scalar_select %p2249_p9, 1, 0 }
  0x18   : > { %s2254_s16 = scalar_select %p44_p7, %s2119_s26, %s46_s10  }
  0x19   : > { %2570 = sst [smem:[#allocation24_spill]] %s2569_s15  ;;  %p2256_p11 = por %p217_p10, %p59_p3 }
  0x1a   : > { %2571 = sst [smem:[#allocation25_spill]] %s2254_s16  ;;  %p224_p13 = scmp.lt.s32.totalorder %s2131_s29, 3 }
  0x1b   : > { %s2572_s17 = scalar_select %p2256_p11, 1, 0 }
  0x1c   : > { %p2262_p0 = pnand %p1535_p12, %p224_p13  ;;  %s2133_s19 = smov [#allocation7]  }
  0x1d   : > { %2573 = sst [smem:[#allocation26_spill]] %s2572_s17  ;;  %s236_s20 = sshll.u32 %s2133_s19, 4  ;;  %s2266_s20 = int_to_ptr.vmem [resolvable:$true] %s236_s20 }
  0x1e   : > { %p1833_p1 = pneg %p2262_p0  ;;  %s2134_s21 = smov [#allocation9]  }
  0x1f   : > { %s252_s22 = sshll.u32 %s2134_s21, 4  ;;  %s2135_s30 = smov [#allocation10]   ;;  %s2276_s22 = int_to_ptr.vmem [resolvable:$true] %s252_s22 }
  0x20   : > { %p2272_p2 = pnand %p1833_p1, %p2237_p5  ;;  %s268_s8 = sshll.u32 %s2135_s30, 4  ;;  %s2278_s8 = int_to_ptr.vmem [resolvable:$true] %s268_s8 }
  0x21   : > { %s1985_s19 = scalar_lea.hbm %s2546_s1, 3072 }
  0x22   : > { %p1986_p3 = scmp.ne.s32.totalorder %s2546_s1, %s1985_s19  ;;  %p2288_p6 = pneg %p2272_p2 }
  0x23   : > { %p1992_p12 = scmp.lt.u32.totalorder %s1985_s19, %s2546_s1 }
  0x24   : > { %p1988_p7 = pnand %p2288_p6, %p1986_p3 }
  0x26   : > { %p1989_p10 = pneg %p1988_p7 }
  0x28   : > { %p1994_p13 = pnand %p1992_p12, %p1989_p10 }
  0x2a   : > { %1997 = shalt.err (!%p1994_p13)
}
  0x2b   : > { %s1998_s9 = scalar_lea.vmem %s2266_s20, 3072  ;;  %p2006_p5 = scmp.lt.s32.totalorder %s2266_s20, %s2266_s20 }
  0x2c   : > { %p1999_p1 = scmp.ne.s32.totalorder %s2266_s20, %s1998_s9  ;;  %p2007_p8 = scmp.lt.s32.totalorder %s1998_s9, %s1998_s9 }
  0x2e   : > { %p2001_p11 = pnand %p1999_p1, %p2288_p6  ;;  %p2008_p3 = por %p2007_p8, %p2006_p5 }
  0x30   : > { %p2002_p9 = pneg %p2001_p11 }
  0x32   : > { %p2009_p7 = pnand %p2008_p3, %p2002_p9 }
  0x34   : > { %2012 = shalt.err (!%p2009_p7)
}
  0x35   : > { %s2136_s16 = smov 64   ;;  %s2137_s17 = smov 4  }
  0x36   : > { %1836 = dma.hbm_to_vmem [thread:$0]  (!%p2272_p2), %s2546_s1, 3072, %s2266_s20, [#allocation8], %s2136_s16, %s2136_s16, %s2137_s17  }
  0x37   : > { %s2013_s9 = scalar_lea.hbm %s2548_s3, 3072 }
  0x38   : > { %p2014_p5 = scmp.ne.s32.totalorder %s2548_s3, %s2013_s9  ;;  %p2020_p11 = scmp.lt.u32.totalorder %s2013_s9, %s2548_s3 }
  0x3a   : > { %p2016_p8 = pnand %p2014_p5, %p2288_p6 }
  0x3c   : > { %p2017_p9 = pneg %p2016_p8 }
  0x3e   : > { %p2022_p10 = pnand %p2020_p11, %p2017_p9 }
  0x40   : > { %2025 = shalt.err (!%p2022_p10)
}
  0x41   : > { %s2026_s20 = scalar_lea.vmem %s2276_s22, 3072  ;;  %p2034_p3 = scmp.lt.s32.totalorder %s2276_s22, %s2276_s22 }
  0x42   : > { %p2027_p12 = scmp.ne.s32.totalorder %s2276_s22, %s2026_s20  ;;  %p2035_p7 = scmp.lt.s32.totalorder %s2026_s20, %s2026_s20 }
  0x44   : > { %p2029_p13 = pnand %p2027_p12, %p2288_p6  ;;  %p2036_p5 = por %p2035_p7, %p2034_p3 }
  0x46   : > { %p2030_p1 = pneg %p2029_p13 }
  0x48   : > { %p2037_p8 = pnand %p2036_p5, %p2030_p1 }
  0x4a   : > { %2040 = shalt.err (!%p2037_p8)
}
  0x4b   : > { %1839 = dma.hbm_to_vmem [thread:$0]  (!%p2272_p2), %s2548_s3, 3072, %s2276_s22, [#allocation8], %s2136_s16, %s2136_s16, %s2137_s17  }
  0x4c   : > { %s2041_s10 = scalar_lea.hbm %s2550_s5, 1024 }
  0x4d   : > { %p2042_p9 = scmp.ne.s32.totalorder %s2550_s5, %s2041_s10  ;;  %p2048_p12 = scmp.lt.u32.totalorder %s2041_s10, %s2550_s5 }
  0x4f   : > { %p2044_p11 = pnand %p2042_p9, %p2288_p6 }
  0x51   : > { %p2045_p10 = pneg %p2044_p11 }
  0x53   : > { %p2050_p13 = pnand %p2048_p12, %p2045_p10 }
  0x55   : > { %2053 = shalt.err (!%p2050_p13)
}
  0x56   : > { %s2054_s22 = scalar_lea.vmem %s2278_s8, 1024  ;;  %p2062_p5 = scmp.lt.s32.totalorder %s2278_s8, %s2278_s8 }
  0x57   : > { %p2055_p1 = scmp.ne.s32.totalorder %s2278_s8, %s2054_s22  ;;  %p2063_p8 = scmp.lt.s32.totalorder %s2054_s22, %s2054_s22 }
  0x59   : > { %p2057_p3 = pnand %p2055_p1, %p2288_p6  ;;  %p2064_p9 = por %p2063_p8, %p2062_p5 }
  0x5b   : > { %p2058_p7 = pneg %p2057_p3 }
  0x5d   : > { %p2065_p11 = pnand %p2064_p9, %p2058_p7 }
  0x5f   : > { %2068 = shalt.err (!%p2065_p11)
}
  0x60   : > { %1842 = dma.hbm_to_vmem [thread:$0]  (!%p2272_p2), %s2550_s5, 1024, %s2278_s8, [#allocation11], %s2136_s16, %s2136_s16, %s2137_s17  }
  0x61   : > { %p1539_p6 = scmp.ge.s32.totalorder %s2131_s29, 2 }
  0x63   : > { %281 = sbr.rel (%p1539_p6) target bundleno = 119 (0x77), region = 40 }
  0x6a   : > { %s285_s23 = sand.u32 1, %s2119_s26   ;;  %s1637_s21 = sshll.u32 %s2127_s28, 7 }
  0x6b   : > { %s1540_s7 = sshll.u32 %s285_s23, 4  ;;  %s298_s8 = scalar_lea.hbm %s2545_s0, %s1637_s21 }
  0x6c   : > { %s1810_s16 = scalar_select %p2233_p4, [#allocation0], [#allocation17] }
  0x6d   : > { %s289_s17 = scalar_lea.vmem [#allocation4], %s1540_s7  ;;  %s2138_s19 = smov 256  }
  0x6e   : > { %s311_s10 = sshll.u32 %s289_s17, 4  ;;  %s303_s13 = sld [smem:[%s1810_s16]]   ;;  %s312_s10 = int_to_ptr.vmem [resolvable:$true] %s311_s10 }
  0x6f   : > { %1811 = sst [smem:[#allocation14]] (%p2233_p4), %s2138_s19  ;;  %s2139_s30 = smov 128  }
  0x70   : > { %1812 = sst [smem:[#allocation14 + $0x1]] (%p2233_p4), %s2139_s30  ;;  %s2140_s9 = smov 2  }
  0x71   : > { %1813 = sst [smem:[#allocation14 + $0x2]] (%p2233_p4), %s2140_s9  ;;  %s2141_s22 = smov 64  }
  0x72   : > { %1814 = sst [smem:[#allocation14 + $0x3]] (%p2233_p4), %s2141_s22  ;;  %s2142_s6 = smov 4  }
  0x73   : > { %1815 = sst [smem:[#allocation14 + $0x4]] (%p2233_p4), %s2141_s22  ;;  %s286_s7 = scalar_lea.sflag [#allocation5], %s285_s23 }
  0x74   : > { %s1543_s20 = sshll.u32 %s303_s13, 26  ;;  %1816 = sst [smem:[#allocation14 + $0x5]] (%p2233_p4), %s2142_s6 }
  0x75   : > { %s1544_s21 = sadd.s32 134217728, %s1543_s20  ;;  %s2143_s24 = smov [#allocation13]  }
  0x76   : > { %1817 = dma.general (%p2233_p4), %s298_s8, 256, %s312_s10, %s286_s7, %s2143_s24, [#allocation14], %s1544_s21, 0  }
  0x77 PF: > { %336 = sbr.rel (%p2262_p0) target bundleno = 691 (0x2b3), region = 48  ;;  %s2391_s15 = sand.u32 (!%p2262_p0), 1, %s2115_s25  }
  0x78   : > { %s1546_s16 = sshll.u32 (!%p2262_p0), %s2391_s15, 4  ;;  %s339_s17 = scalar_lea.sflag (!%p2262_p0), [#allocation5], %s2391_s15 }
  0x79   : > { %s2395_s13 = scalar_lea.vmem (!%p2262_p0), [#allocation4], %s1546_s16  ;;  %p2577_p2 = scmp.ne.s32.totalorder (!%p2262_p0), %s2568_s14, 0 }
  0x7e   : > { %2094 = dma.done.wait (%p2577_p2), %s339_s17, 256  }
  0x7f   : > { %2096 = vsyncadd (%p2577_p2), %s339_s17, 4294967040  ;;  %p2578_p4 = scmp.ne.s32.totalorder %s2567_s12, 0 }
  0x81   : > { %2098 = dma.done.wait (%p2578_p4), [#allocation8], 6144  }
  0x82   : > { %2100 = vsyncadd (%p2578_p4), [#allocation8], 4294961152 }
  0x83   : > { %2102 = dma.done.wait (%p2578_p4), [#allocation11], 1024  }
  0x84   : > { %2104 = vsyncadd (%p2578_p4), [#allocation11], 4294966272  ;;  %s2409_s11 = scalar_lea.vmem [#allocation12], %s1546_s16  ;;  %p1551_p0 = scmp.ne.s32.totalorder %s2123_s27, 0 }
  0x85   : > { %v2144_v0 = vmov (!%p1551_p0), 0  }
  0x86   : > { %393 = sbr.rel (%p1551_p0) target bundleno = 141 (0x8d), region = 68  ;;  %394 = vst [vmem:[#allocation2] sm:$0x1] (!%p1551_p0), %v2144_v0  ;;  %395 = vst [vmem:[#allocation2 + $0xc] sm:$0x1] (!%p1551_p0), %v2144_v0 }
  0x87   : > { %396 = vst [vmem:[#allocation3] sm:$0x1] (!%p1551_p0), %v2144_v0  ;;  %397 = vst [vmem:[#allocation3 + $0xc] sm:$0x1] (!%p1551_p0), %v2144_v0 }
  0x8d PF: > { %v1921_v1 = vld [vmem:[#allocation7 + $0x40] sm:$0xff]   ;;  %v1924_v4 = vld [vmem:[#allocation7 + $0x48] sm:$0xff]   ;;  %v1927_v7 = vld [vmem:[#allocation7 + $0x50] sm:$0xff]   ;;  %vm406_vm0 = vcmask 1040384   ;;  %vm407_vm1 = vcmask 1044484   ;;  %vm482_vm3 = vcmask 1046528  }
  0x8e   : > { %v1922_v2 = vld [vmem:[#allocation7] sm:$0xff]   ;;  %1658 = vmatprep.subr.bf16.mxu0 %v1921_v1  ;;  %v1925_v5 = vld [vmem:[#allocation7 + $0x8] sm:$0xff]   ;;  %v1928_v8 = vld [vmem:[#allocation7 + $0x10] sm:$0xff]   ;;  %vm455_vm4 = vsmask.f32 7424  ;;  %vm1185_vm5 = vcmask 1042432  }
  0x8f   : > { %v1923_v3 = vld [vmem:[#allocation7 + $0x80] sm:$0xff]   ;;  %1659 = vmatpush3.bf16.msra.mxu0 %v1922_v2  ;;  %v1926_v6 = vld [vmem:[#allocation7 + $0x88] sm:$0xff]   ;;  %v1929_v9 = vld [vmem:[#allocation7 + $0x90] sm:$0xff]   ;;  %vm1186_vm6 = vcmask 1046532   ;;  %s1358_s18 = sadd.s32 1, %s2123_s27  ;;  %s2583_s30 = sld [smem:[#allocation27_spill]] }
  0x90   : > { %1744 = vmatprep.subr.bf16.mxu1 %v1923_v3  ;;  %1660 = vmatprep.subr.bf16.mxu0 %v1924_v4  ;;  %v1930_v10 = vld [vmem:[#allocation7 + $0x58] sm:$0xff]   ;;  %v1933_v13 = vld [vmem:[#allocation7 + $0x60] sm:$0xff]   ;;  %v1936_v16 = vld [vmem:[#allocation7 + $0x68] sm:$0xff]   ;;  %p1631_p10 = scmp.ge.s32.totalorder %s1358_s18, 2 }
  0x91   : > { %1745 = vmatpush3.bf16.msra.mxu1 %v1923_v3  ;;  %v1931_v11 = vld [vmem:[#allocation7 + $0x18] sm:$0xff]   ;;  %v1935_v14 = vld [vmem:[#allocation7 + $0xa0] sm:$0xff]   ;;  %v1938_v17 = vld [vmem:[#allocation7 + $0xa8] sm:$0xff]  }
  0x92   : > { %1746 = vmatprep.subr.bf16.mxu1 %v1926_v6  ;;  %v1932_v12 = vld [vmem:[#allocation7 + $0x98] sm:$0xff]   ;;  %v1934_v15 = vld [vmem:[#allocation7 + $0x20] sm:$0xff]   ;;  %v1937_v18 = vld [vmem:[#allocation7 + $0x28] sm:$0xff]  }
  0x93   : > { %1661 = vmatpush3.bf16.msra.mxu0 %v1925_v5  ;;  %v1939_v19 = vld [vmem:[#allocation7 + $0x70] sm:$0xff]   ;;  %v1942_v22 = vld [vmem:[#allocation7 + $0x78] sm:$0xff]   ;;  %vm2417_vm2 = vmor %vm406_vm0, %vm407_vm1 }
  0x94   : > { %1662 = vmatprep.subr.bf16.mxu0 %v1927_v7  ;;  %v1940_v20 = vld [vmem:[#allocation7 + $0x30] sm:$0xff]   ;;  %v1944_v23 = vld [vmem:[#allocation7 + $0xb8] sm:$0xff]   ;;  %v1950_v7 = vld [vmem:[#allocation9] sm:$0xff]  }
  0x95   : > { %1747 = vmatpush3.bf16.msra.mxu1 %v1926_v6  ;;  %v1941_v21 = vld [vmem:[#allocation7 + $0xb0] sm:$0xff]   ;;  %v1943_v26 = vld [vmem:[#allocation7 + $0x38] sm:$0xff]   ;;  %v1949_v6 = vld [vmem:[#allocation9 + $0x40] sm:$0xff]  }
  0x96   : > { %1748 = vmatprep.subr.bf16.mxu1 %v1929_v9  ;;  %v398_v24 = vld [vmem:[%s2395_s13] sm:$0xf]  ;;  %v399_v25 = vld [vmem:[%s2395_s13 + $0x4] sm:$0xf]  ;;  %v400_v29 = vld [vmem:[%s2395_s13 + $0x8] sm:$0xf] }
  0x97   : > { %1663 = vmatpush3.bf16.msra.mxu0 %v1928_v8  ;;  %v409_v27 = vrot.slane %v398_v24, 7  ;;  %v411_v28 = vrot.slane %v399_v25, 7  ;;  %v401_v30 = vld [vmem:[%s2395_s13 + $0xc] sm:$0xf]  ;;  %v414_v32 = vrot.slane %v400_v29, 7  ;;  %v1967_v24 = vld [vmem:[#allocation9 + $0x30] sm:$0xff]   ;;  %vm2455_vm7 = vmor %vm1185_vm5, %vm1186_vm6 }
  0x98   : > { %1664 = vmatprep.subr.bf16.mxu0 %v1930_v10  ;;  %v416_v33 = vrot.slane %v401_v30, 7  ;;  %v1951_v8 = vld [vmem:[#allocation9 + $0x48] sm:$0xff]   ;;  %v1953_v10 = vld [vmem:[#allocation9 + $0x80] sm:$0xff]   ;;  %v1975_v30 = vld [vmem:[#allocation9 + $0xb8] sm:$0xff]  }
  0x99   : > { %1749 = vmatpush3.bf16.msra.mxu1 %v1929_v9  ;;  %v410_v34 = vrot.slane %v409_v27, 4  ;;  %v413_v35 = vrot.slane %v411_v28, 4  ;;  %425 = vst [vmem:[#allocation2] sm:$0xe] %v409_v27  ;;  %v415_v36 = vrot.slane %v414_v32, 4  ;;  %v1952_v9 = vld [vmem:[#allocation9 + $0x8] sm:$0xff]  }
  0x9a   : > { %1750 = vmatprep.subr.bf16.mxu1 %v1932_v12  ;;  %v418_v37 = vrot.slane %v416_v33, 4  ;;  %428 = vst [vmem:[#allocation2 + $0xc] sm:$0xe] %v414_v32  ;;  %v1968_v25 = vld [vmem:[#allocation9 + $0xa8] sm:$0xff]   ;;  %v1970_v27 = vld [vmem:[#allocation9 + $0x38] sm:$0xff]   ;;  %v2449_v29 = vld [vmem:[#allocation10] sm:$0xff]  }
  0x9b   : > { %1665 = vmatpush3.bf16.msra.mxu0 %v1931_v11  ;;  %v412_v38 = vsel %vm2417_vm2, %v410_v34, %v411_v28  ;;  %427 = vst [vmem:[#allocation2 + $0x8] sm:$0x1] %v413_v35  ;;  %v417_v39 = vsel %vm2417_vm2, %v415_v36, %v416_v33  ;;  %v1954_v11 = vld [vmem:[#allocation9 + $0x50] sm:$0xff]   ;;  %v1982_v35 = vld [vmem:[#allocation10 + $0x28] sm:$0xff]  }
  0x9c   : > { %1666 = vmatprep.subr.bf16.mxu0 %v1933_v13  ;;  %426 = vst [vmem:[#allocation2 + $0x4] sm:$0xf] %v412_v38  ;;  %430 = vst [vmem:[#allocation2 + $0x14] sm:$0x1] %v418_v37  ;;  %v1956_v13 = vld [vmem:[#allocation9 + $0x88] sm:$0xff]   ;;  %v1971_v28 = vld [vmem:[#allocation9 + $0xb0] sm:$0xff]  }
  0x9d   : > { %1751 = vmatpush3.bf16.msra.mxu1 %v1932_v12  ;;  %429 = vst [vmem:[#allocation2 + $0x10] sm:$0xf] %v417_v39  ;;  %v1955_v12 = vld [vmem:[#allocation9 + $0x10] sm:$0xff]  }
  0x9e   : > { %1752 = vmatprep.subr.bf16.mxu1 %v1935_v14 }
  0x9f   : > { %1667 = vmatpush3.bf16.msra.mxu0 %v1934_v15  ;;  %v1958_v15 = vld [vmem:[#allocation9 + $0x18] sm:$0xff]  }
  0xa0   : > { %1668 = vmatprep.subr.bf16.mxu0 %v1936_v16  ;;  %v2425_v40 = vld [vmem:[#allocation2] sm:$0xf] }
  0xa1   : > { %1753 = vmatpush3.bf16.msra.mxu1 %v1935_v14  ;;  %v2429_v42 = vld [vmem:[#allocation2 + $0xc] sm:$0xf]  ;;  %v1959_v16 = vld [vmem:[#allocation9 + $0x90] sm:$0xff]  }
  0xa2   : > { %1754 = vmatprep.subr.bf16.mxu1 %v1938_v17  ;;  %v2427_v41 = vld [vmem:[#allocation2 + $0x8] sm:$0x1]  ;;  %v1615_v33 = vrot.slane %v2429_v42, 9 }
  0xa3   : > { %1669 = vmatpush3.bf16.msra.mxu0 %v1937_v18  ;;  %v2431_v43 = vld [vmem:[#allocation2 + $0x4] sm:$0xf]  ;;  %v1554_v44 = vcombine.low %v2427_v41, %v2427_v41  ;;  %v2435_v45 = vld [vmem:[#allocation2 + $0x14] sm:$0x1]  ;;  %v1957_v14 = vld [vmem:[#allocation9 + $0x58] sm:$0xff]   ;;  %v1193_v31 = vrot.slane %v2427_v41, 5 }
  0xa4   : > { %1670 = vmatprep.subr.bf16.mxu0 %v1939_v19  ;;  %v1552_v46 = vcombine.low %v2425_v40, %v2431_v43  ;;  %v2439_v47 = vld [vmem:[#allocation2 + $0x10] sm:$0xf]  ;;  %v1555_v48 = vcombine.low %v2435_v45, %v2435_v45  ;;  %v1962_v19 = vld [vmem:[#allocation9 + $0x98] sm:$0xff]   ;;  %v1200_v34 = vrot.slane %v2435_v45, 5  ;;  %v1979_v41 = vld [vmem:[#allocation10 + $0x10] sm:$0xff]  }
  0xa5   : > { %1755 = vmatpush3.bf16.msra.mxu1 %v1938_v17  ;;  %v464_v49 = vshll.u32 %v1554_v44, 16  ;;  %v484_v50 = vrot.slane %v1554_v44, 1  ;;  %v1553_v51 = vcombine.low %v2429_v42, %v2439_v47  ;;  %v1960_v17 = vld [vmem:[#allocation9 + $0x60] sm:$0xff]   ;;  %v1197_v32 = vrot.slane %v2439_v47, 5 }
  0xa6   : > { %1756 = vmatprep.subr.bf16.mxu1 %v1941_v21  ;;  %v457_v52 = vshrl.u32 %v1552_v46, 16  ;;  %v459_v53 = vshll.u32 %v1552_v46, 16  ;;  %v483_v54 = vrot.slane %v1552_v46, 1  ;;  %v487_v55 = vrot.slane %v1555_v48, 1  ;;  %v1961_v18 = vld [vmem:[#allocation9 + $0x20] sm:$0xff]  }
  0xa7   : > { %1671 = vmatpush3.bf16.msra.mxu0 %v1940_v20  ;;  %v466_v56 = vrot.slane %v464_v49, 1  ;;  %v486_v57 = vrot.slane %v1553_v51, 1  ;;  %v469_v58 = vshrl.u32 %v1553_v51, 16  ;;  %v471_v59 = vshll.u32 %v1553_v51, 16  ;;  %v1963_v20 = vld [vmem:[#allocation9 + $0x68] sm:$0xff]  }
  0xa8   : > { %1672 = vmatprep.subr.bf16.mxu0 %v1942_v22  ;;  %v461_v60 = vrot.slane %v459_v53, 1  ;;  %v485_v61 = vsel %vm482_vm3, %v483_v54, %v484_v50  ;;  %v476_v62 = vshll.u32 %v1555_v48, 16  ;;  %v1965_v22 = vld [vmem:[#allocation9 + $0xa0] sm:$0xff]   ;;  %v1199_v36 = vrot.slane %v1197_v32, 4  ;;  %v1556_v49 = vld [vmem:[%s2547_s2] ss:$0 sm:$0xff] }
  0xa9   : > { %1757 = vmatpush3.bf16.msra.mxu1 %v1941_v21  ;;  %1760 = vmatprep.mubr.bf16.mxu1 %v485_v61  ;;  %v488_v63 = vsel %vm482_vm3, %v486_v57, %v487_v55  ;;  %v473_v0 = vrot.slane %v471_v59, 1  ;;  %v1964_v21 = vld [vmem:[#allocation9 + $0x28] sm:$0xff]   ;;  %v2461_v37 = vsel %vm2455_vm7, %v1615_v33, %v1197_v32  ;;  %v1190_v32 = vrot.slane %v2431_v43, 5 }
  0xaa   : > { %1758 = vmatprep.subr.bf16.mxu1 %v1944_v23  ;;  %v462_v1 = vor.u32 %v461_v60, %v457_v52  ;;  %v478_v2 = vrot.slane %v476_v62, 1  ;;  %v2465_v38 = vsel %vm2455_vm7, %v1199_v36, %v1200_v34 }
  0xab   : > { %1673 = vmatpush3.bf16.msra.mxu0 %v1943_v26  ;;  %v474_v3 = vor.u32 %v473_v0, %v469_v58  ;;  %v1969_v26 = vld [vmem:[#allocation9 + $0x78] sm:$0xff]   ;;  %v1618_v39 = vcombine.low %v2461_v37, %v2465_v38 }
  0xac   : > { %v467_v4 = vsel %vm455_vm4, %v462_v1, %v466_v56  ;;  %1696 = vmatprep.subr.bf16.mxu0 %v1949_v6 }
  0xad   : > { %1759 = vmatpush3.bf16.msra.mxu1 %v1944_v23  ;;  %722 = vmatprep.mubr.bf16.mxu0 %v467_v4  ;;  %v479_v5 = vsel %vm455_vm4, %v474_v3, %v478_v2  ;;  %v1966_v23 = vld [vmem:[#allocation9 + $0x70] sm:$0xff]  }
  0xae   : > { %723 = vmatmul.mubr.bf16.vlgmr.msra.gmra.mrb[0].mxu0 %v1552_v46  ;;  %1764 = vmatprep.subr.bf16.mxu1 %v1953_v10 }
  0xaf   : > { %730 = vmatprep.mubr.bf16.mxu0 %v479_v5  ;;  %1697 = vmatpush3.bf16.msra.mxu0 %v1950_v7 }
  0xb0   : > { %1761 = vmatmul.mubr.bf16.vlgmr.msra.gmra.mrb[0].mxu1 %v488_v63  ;;  %1698 = vmatprep.subr.bf16.mxu0 %v1951_v8 }
  0xb1   : > { %1765 = vmatpush3.bf16.msra.mxu1 %v1953_v10 }
  0xb2   : > { %1766 = vmatprep.subr.bf16.mxu1 %v1956_v13 }
  0xb3   : > { %1699 = vmatpush3.bf16.msra.mxu0 %v1952_v9 }
  0xb4   : > { %1700 = vmatprep.subr.bf16.mxu0 %v1954_v11 }
  0xb5   : > { %1767 = vmatpush3.bf16.msra.mxu1 %v1956_v13 }
  0xb6   : > { %731 = vmatmul.mubr.bf16.gmra.mrb[4].mxu0 %v1553_v51  ;;  %1768 = vmatprep.subr.bf16.mxu1 %v1959_v16 }
  0xb7   : > { %1701 = vmatpush3.bf16.msra.mxu0 %v1955_v12 }
  0xb8   : > { %1702 = vmatprep.subr.bf16.mxu0 %v1957_v14 }
  0xb9   : > { %1769 = vmatpush3.bf16.msra.mxu1 %v1959_v16 }
  0xba   : > { %1770 = vmatprep.subr.bf16.mxu1 %v1962_v19 }
  0xbb   : > { %1703 = vmatpush3.bf16.msra.mxu0 %v1958_v15 }
  0xbc   : > { %1704 = vmatprep.subr.bf16.mxu0 %v1960_v17 }
  0xbd   : > { %1771 = vmatpush3.bf16.msra.mxu1 %v1962_v19 }
  0xbe   : > { %1772 = vmatprep.subr.bf16.mxu1 %v1965_v22 }
  0xbf   : > { %1705 = vmatpush3.bf16.msra.mxu0 %v1961_v18 }
  0xc0   : > { %1706 = vmatprep.subr.bf16.mxu0 %v1963_v20 }
  0xc1   : > { %1773 = vmatpush3.bf16.msra.mxu1 %v1965_v22 }
  0xc2   : > { %1774 = vmatprep.subr.bf16.mxu1 %v1968_v25 }
  0xc3   : > { %1707 = vmatpush3.bf16.msra.mxu0 %v1964_v21 }
  0xc4   : > { %1708 = vmatprep.subr.bf16.mxu0 %v1966_v23 }
  0xc5   : > { %1775 = vmatpush3.bf16.msra.mxu1 %v1968_v25 }
  0xc6   : > { %1776 = vmatprep.subr.bf16.mxu1 %v1971_v28 }
  0xc7   : > { %1709 = vmatpush3.bf16.msra.mxu0 %v1967_v24 }
  0xc8   : > { %1710 = vmatprep.subr.bf16.mxu0 %v1969_v26 }
  0xc9   : > { %1777 = vmatpush3.bf16.msra.mxu1 %v1971_v28 }
  0xca   : > { %1778 = vmatprep.subr.bf16.mxu1 %v1975_v30 }
  0xcb   : > { %1711 = vmatpush3.bf16.msra.mxu0 %v1970_v27 }
  0xcc   : > { %1784 = vmatprep.subr.bf16.mxu0 %v2449_v29 }
  0xcd   : > { %1779 = vmatpush3.bf16.msra.mxu1 %v1975_v30 }
 0x181   : > { %v1674_v47 = vpop.f32.mrb[0].mxu0 }
 0x182   : > { %v1675_v48 = vpop.f32.mrb[1].mxu0 }
 0x183   : > { %v1762_v42 = vpop.f32.mrb[0].mxu1  ;;  %v1676_v50 = vadd.f32 %v1675_v48, %v1674_v47  ;;  %v1677_v51 = vpop.f32.mrb[2].mxu0  ;;  %v1192_v47 = vrot.slane %v1190_v32, 4 }
 0x184   : > { %v773_v44 = vpop.f32.mrb[1].mxu1  ;;  %v1678_v52 = vpop.f32.mrb[3].mxu0 }
 0x185   : > { %v1763_v45 = vpop.f32.mrb[2].mxu1  ;;  %v725_v53 = vadd.f32 %v1676_v50, %v1556_v49  ;;  %v1679_v54 = vadd.f32 %v1678_v52, %v1677_v51 }
 0x186   : > { %v776_v46 = vpop.f32.mrb[3].mxu1 }
 0x187   : > { %v774_v55 = vadd.f32 %v773_v44, %v725_v53  ;;  %v728_v56 = vadd.f32 %v1679_v54, %v1556_v49  ;;  %v1976_v44 = vld [vmem:[#allocation10 + $0x8] sm:$0xff]  }
 0x189   : > { %v788_v57 = vmax.f32 %v774_v55, 0.0  ;;  %v777_v58 = vadd.f32 %v776_v46, %v728_v56  ;;  %v1680_v59 = vpop.f32.mrb[4].mxu0  ;;  %v1614_v46 = vrot.slane %v2425_v40, 9  ;;  %v1194_v40 = vsel %vm2455_vm7, %v1192_v47, %v1193_v31 }
 0x18a   : > { %v1681_v60 = vpop.f32.mrb[5].mxu0 }
 0x18b   : > { %v1638_v61 = vpack.c.bf16 %v788_v57, %v788_v57  ;;  %v789_v62 = vmax.f32 %v777_v58, 0.0  ;;  %v1682_v63 = vadd.f32 %v1681_v60, %v1680_v59  ;;  %v1683_v0 = vpop.f32.mrb[6].mxu0  ;;  %v1191_v54 = vsel %vm2455_vm7, %v1614_v46, %v1190_v32  ;;  %v1980_v59 = vld [vmem:[#allocation10 + $0x18] sm:$0xff]   ;;  %v1981_v60 = vld [vmem:[#allocation10 + $0x20] sm:$0xff]  }
 0x18c   : > { %v1684_v1 = vpop.f32.mrb[7].mxu0  ;;  %v1617_v58 = vcombine.low %v1191_v54, %v1194_v40 }
 0x18d   : > { %v804_v2 = vrot.slane %v1638_v61, 7  ;;  %v1639_v3 = vpack.c.bf16 %v789_v62, %v789_v62  ;;  %v733_v4 = vadd.f32 %v1682_v63, %v1556_v49  ;;  %v1685_v5 = vadd.f32 %v1684_v1, %v1683_v0  ;;  %v1983_v61 = vld [vmem:[#allocation10 + $0x30] sm:$0xff]   ;;  %v1984_v62 = vld [vmem:[#allocation10 + $0x38] sm:$0xff]  }
 0x18e   : > { %v1589_v1 = vld [vmem:[%s2549_s4] ss:$0 sm:$0xff] }
 0x18f   : > { %v805_v6 = vrot.slane %v804_v2, 4  ;;  %820 = vst [vmem:[#allocation3] sm:$0xe] %v804_v2  ;;  %v806_v7 = vrot.slane %v1639_v3, 7  ;;  %v782_v8 = vadd.f32 %v1762_v42, %v733_v4  ;;  %v736_v9 = vadd.f32 %v1685_v5, %v1556_v49 }
 0x191   : > { %v807_v10 = vsel %vm2417_vm2, %v805_v6, %v806_v7  ;;  %v808_v11 = vrot.slane %v806_v7, 4  ;;  %v790_v12 = vmax.f32 %v782_v8, 0.0  ;;  %v785_v13 = vadd.f32 %v1763_v45, %v736_v9 }
 0x192   : > { %821 = vst [vmem:[#allocation3 + $0x4] sm:$0xf] %v807_v10 }
 0x193   : > { %822 = vst [vmem:[#allocation3 + $0x8] sm:$0x1] %v808_v11  ;;  %v1640_v14 = vpack.c.bf16 %v790_v12, %v790_v12  ;;  %v791_v15 = vmax.f32 %v785_v13, 0.0 }
 0x195   : > { %v809_v16 = vrot.slane %v1640_v14, 7  ;;  %v1641_v17 = vpack.c.bf16 %v791_v15, %v791_v15 }
 0x197   : > { %v810_v18 = vrot.slane %v809_v16, 4  ;;  %823 = vst [vmem:[#allocation3 + $0xc] sm:$0xe] %v809_v16  ;;  %v811_v19 = vrot.slane %v1641_v17, 7 }
 0x199   : > { %v812_v20 = vsel %vm2417_vm2, %v810_v18, %v811_v19  ;;  %v813_v21 = vrot.slane %v811_v19, 4  ;;  %v1972_v22 = vld [vmem:[#allocation3] sm:$0xff]  }
 0x19a   : > { %824 = vst [vmem:[#allocation3 + $0x10] sm:$0xf] %v812_v20  ;;  %v1973_v23 = vld [vmem:[#allocation3 + $0x8] ss:$0 sps:$4 sm:$0x11]   ;;  %v876_v24 = vrot.slane %v1972_v22, 1 }
 0x19b   : > { %825 = vst [vmem:[#allocation3 + $0x14] sm:$0x1] %v813_v21  ;;  %v853_v25 = vshll.u32 %v1972_v22, 16  ;;  %v877_v26 = vrot.slane %v1973_v23, 1  ;;  %v858_v27 = vshll.u32 %v1973_v23, 16  ;;  %v851_v28 = vshrl.u32 %v1972_v22, 16 }
 0x19c   : > { %v1616_v21 = vld [vmem:[%s2583_s30] ss:$0 sm:$0xff] }
 0x19d   : > { %v855_v30 = vrot.slane %v853_v25, 1  ;;  %v878_v33 = vsel %vm482_vm3, %v876_v24, %v877_v26  ;;  %v860_v34 = vrot.slane %v858_v27, 1 }
 0x19e   : > { %1780 = vmatprep.mubr.bf16.mxu1 %v878_v33 }
 0x19f   : > { %v856_v36 = vor.u32 %v855_v30, %v851_v28 }
 0x1a1   : > { %v861_v42 = vsel %vm455_vm4, %v856_v36, %v860_v34  ;;  %v1977_v45 = vld [vmem:[#allocation3 + $0xc] sm:$0xff]  }
 0x1a2   : > { %1115 = vmatprep.mubr.bf16.mxu0 %v861_v42  ;;  %v1978_v48 = vld [vmem:[#allocation3 + $0x14] ss:$0 sps:$4 sm:$0x11]   ;;  %v879_v49 = vrot.slane %v1977_v45, 1  ;;  %v865_v50 = vshll.u32 %v1977_v45, 16  ;;  %v863_v52 = vshrl.u32 %v1977_v45, 16 }
 0x1a3   : > { %1116 = vmatmul.mubr.bf16.vlgmr.msra.gmra.mrb[8].mxu0 %v1972_v22  ;;  %v880_v43 = vrot.slane %v1978_v48, 1  ;;  %v870_v51 = vshll.u32 %v1978_v48, 16 }
 0x1a4   : > { %1785 = vmatpush3.bf16.msra.mxu0 %v2449_v29  ;;  %v867_v53 = vrot.slane %v865_v50, 1 }
 0x1a5   : > { %1786 = vmatprep.subr.bf16.mxu0 %v1976_v44  ;;  %v881_v55 = vsel %vm482_vm3, %v879_v49, %v880_v43  ;;  %v872_v56 = vrot.slane %v870_v51, 1  ;;  %v1363_v51 = vld [vmem:[#allocation2 + $0x8] sm:$0x1] (!%p1631_p10) }
 0x1a6   : > { %1781 = vmatmul.mubr.bf16.vlgmr.msra.gmra.mrb[4].mxu1 %v881_v55  ;;  %v868_v57 = vor.u32 %v867_v53, %v863_v52  ;;  %v1364_v52 = vld [vmem:[#allocation2 + $0x14] sm:$0x1] (!%p1631_p10)  ;;  %v1367_v53 = vld [vmem:[#allocation3 + $0x8] sm:$0x1] (!%p1631_p10)  ;;  %1365 = vst [vmem:[#allocation2] sm:$0x1] (!%p1631_p10), %v1363_v51 }
 0x1a7   : > { %1366 = vst [vmem:[#allocation2 + $0xc] sm:$0x1] (!%p1631_p10), %v1364_v52  ;;  %1369 = vst [vmem:[#allocation3] sm:$0x1] (!%p1631_p10), %v1367_v53 }
 0x1a8   : > { %1787 = vmatpush3.bf16.msra.mxu0 %v1976_v44  ;;  %v873_v29 = vsel %vm455_vm4, %v868_v57, %v872_v56 }
 0x1a9   : > { %1788 = vmatprep.subr.bf16.mxu0 %v1979_v41  ;;  %1123 = vmatprep.mubr.bf16.mxu0 %v873_v29 }
 0x1ab   : > { %1124 = vmatmul.mubr.bf16.gmra.mrb[12].mxu0 %v1977_v45 }
 0x1ac   : > { %1789 = vmatpush3.bf16.msra.mxu0 %v1979_v41  ;;  %1800 = vmatprep.mubr.bf16.mxu0 %v1617_v58  ;;  %v1368_v41 = vld [vmem:[#allocation3 + $0x14] sm:$0x1] (!%p1631_p10) }
 0x1ad   : > { %1790 = vmatprep.subr.bf16.mxu0 %v1980_v59  ;;  %1370 = vst [vmem:[#allocation3 + $0xc] sm:$0x1] (!%p1631_p10), %v1368_v41 }
 0x1b0   : > { %1791 = vmatpush3.bf16.msra.mxu0 %v1980_v59 }
 0x1b1   : > { %1792 = vmatprep.subr.bf16.mxu0 %v1981_v60 }
 0x1b4   : > { %1793 = vmatpush3.bf16.msra.mxu0 %v1981_v60 }
 0x1b5   : > { %1794 = vmatprep.subr.bf16.mxu0 %v1982_v35 }
 0x1b8   : > { %1795 = vmatpush3.bf16.msra.mxu0 %v1982_v35 }
 0x1b9   : > { %1796 = vmatprep.subr.bf16.mxu0 %v1983_v61 }
 0x1bc   : > { %1797 = vmatpush3.bf16.msra.mxu0 %v1983_v61 }
 0x1bd   : > { %1798 = vmatprep.subr.bf16.mxu0 %v1984_v62 }
 0x1c0   : > { %1799 = vmatpush3.bf16.msra.mxu0 %v1984_v62 }
 0x1c3   : > { %1801 = vmatmul.mubr.bf16.vlgmr.msra.gmra.mrb[16].mxu0 %v1618_v39 }
 0x276   : > { %v1712_v63 = vpop.f32.mrb[8].mxu0 }
 0x277   : > { %v1713_v0 = vpop.f32.mrb[9].mxu0 }
 0x278   : > { %v1714_v2 = vadd.f32 %v1713_v0, %v1712_v63  ;;  %v1715_v3 = vpop.f32.mrb[10].mxu0 }
 0x279   : > { %v1716_v4 = vpop.f32.mrb[11].mxu0  ;;  %v1782_v6 = vpop.f32.mrb[4].mxu1 }
 0x27a   : > { %v1717_v5 = vadd.f32 %v1716_v4, %v1715_v3  ;;  %v1118_v7 = vadd.f32 %v1714_v2, %v1589_v1  ;;  %v1166_v8 = vpop.f32.mrb[5].mxu1 }
 0x27b   : > { %v1783_v10 = vpop.f32.mrb[6].mxu1 }
 0x27c   : > { %v1167_v9 = vadd.f32 %v1166_v8, %v1118_v7  ;;  %v1121_v11 = vadd.f32 %v1717_v5, %v1589_v1  ;;  %v1169_v12 = vpop.f32.mrb[7].mxu1 }
 0x27e   : > { %v1170_v37 = vadd.f32 %v1169_v12, %v1121_v11  ;;  %v1718_v38 = vpop.f32.mrb[12].mxu0  ;;  %v1181_v26 = vmax.f32 %v1167_v9, 0.0 }
 0x27f   : > { %v1719_v39 = vpop.f32.mrb[13].mxu0 }
 0x280   : > { %v1720_v13 = vadd.f32 %v1719_v39, %v1718_v38  ;;  %v1721_v14 = vpop.f32.mrb[14].mxu0  ;;  %v1182_v36 = vmax.f32 %v1170_v37, 0.0 }
 0x281   : > { %v1722_v15 = vpop.f32.mrb[15].mxu0 }
 0x282   : > { %v1126_v16 = vadd.f32 %v1720_v13, %v1589_v1  ;;  %v1723_v17 = vadd.f32 %v1722_v15, %v1721_v14 }
 0x284   : > { %v1175_v18 = vadd.f32 %v1782_v6, %v1126_v16  ;;  %v1129_v19 = vadd.f32 %v1723_v17, %v1589_v1 }
 0x286   : > { %v1178_v20 = vadd.f32 %v1783_v10, %v1129_v19  ;;  %v1183_v23 = vmax.f32 %v1175_v18, 0.0 }
 0x288   : > { %v1184_v32 = vmax.f32 %v1178_v20, 0.0 }
 0x296   : > { %v1802_v22 = vpop.f32.mrb[16].mxu0 }
 0x297   : > { %v1324_v24 = vadd.f32 %v1802_v22, %v1616_v21  ;;  %v1315_v25 = vpop.f32.mrb[17].mxu0 }
 0x298   : > { %v1316_v27 = vadd.f32 %v1616_v21, %v1315_v25  ;;  %v1803_v28 = vpop.f32.mrb[18].mxu0 }
 0x299   : > { %v1332_v30 = vadd.f32 %v1324_v24, %v1183_v23  ;;  %v1327_v33 = vadd.f32 %v1803_v28, %v1616_v21  ;;  %v1318_v34 = vpop.f32.mrb[19].mxu0 }
 0x29a   : > { %v1330_v31 = vadd.f32 %v1316_v27, %v1181_v26  ;;  %v1319_v42 = vadd.f32 %v1616_v21, %v1318_v34 }
 0x29b   : > { %v1333_v44 = vadd.f32 %v1327_v33, %v1184_v32  ;;  %v1336_v46 = vmax.f32 %v1332_v30, 0.0 }
 0x29c   : > { %v1331_v45 = vadd.f32 %v1319_v42, %v1182_v36  ;;  %v1334_v48 = vmax.f32 %v1330_v31, 0.0  ;;  %1362 = sbr.rel (%p1631_p10) target bundleno = 675 (0x2a3), region = 72 }
 0x29d   : > { %v1337_v47 = vmax.f32 %v1333_v44, 0.0 }
 0x29e   : > { %v1335_v49 = vmax.f32 %v1331_v45, 0.0 }
 0x29f   : > { %v1655_v50 = vpack.c.bf16 %v1337_v47, %v1336_v46 }
 0x2a0   : > { %v1650_v43 = vpack.c.bf16 %v1335_v49, %v1334_v48 }
 0x2a1   : > { %1657 = vst [vmem:[%s2409_s11 + $0x8] sm:$0xff] %v1655_v50  }
 0x2a2   : > { %1651 = vst [vmem:[%s2409_s11] sm:$0xff] %v1650_v43  }
 0x2a3 PF: > { %s1372_s9 = scalar_lea.sflag [#allocation6], %s2391_s15 }
 0x2a4   : > { %s2584_s22 = sld [smem:[#allocation24_spill]]  ;;  %s1646_s20 = sshll.u32 %s2123_s27, 7 }
 0x2a5   : > { %s1404_s6 = sshll.u32 %s2409_s11, 4  ;;  %s2585_s24 = sld [smem:[#allocation28_spill]]  ;;  %s1405_s6 = int_to_ptr.vmem [resolvable:$true] %s1404_s6 }
 0x2a6   : > { %s2145_s17 = smov 128   ;;  %s2146_s15 = smov 256  }
 0x2a7   : > { %s2147_s13 = smov 2   ;;  %s2148_s12 = smov 64  }
 0x2a8   : > { %s2149_s27 = smov 4   ;;  %s2150_s11 = smov [#allocation15]  }
 0x2a9   : > { %s2151_s14 = smov 0  }
 0x2aa   : > { %p2586_p12 = scmp.ne.s32.totalorder %s2584_s22, 0 }
 0x2ab   : > { %s1387_s16 = scalar_lea.hbm %s2585_s24, %s1646_s20 }
 0x2ac   : > { %1825 = sst [smem:[#allocation16]] (%p2586_p12), %s2145_s17 }
 0x2ad   : > { %1826 = sst [smem:[#allocation16 + $0x1]] (%p2586_p12), %s2146_s15 }
 0x2ae   : > { %1827 = sst [smem:[#allocation16 + $0x2]] (%p2586_p12), %s2147_s13 }
 0x2af   : > { %1828 = sst [smem:[#allocation16 + $0x3]] (%p2586_p12), %s2148_s12 }
 0x2b0   : > { %1829 = sst [smem:[#allocation16 + $0x4]] (%p2586_p12), %s2148_s12 }
 0x2b1   : > { %1830 = sst [smem:[#allocation16 + $0x5]] (%p2586_p12), %s2149_s27 }
 0x2b2   : > { %1831 = dma.general (%p2586_p12), %s1405_s6, 256, %s1387_s16, %s1372_s9, %s2150_s11, [#allocation16], %s2151_s14, 0  }
 0x2b3 PF: > { %s2587_s18 = sld [smem:[#allocation22_spill]]  ;;  %s2588_s23 = sld [smem:[#allocation26_spill]] }
 0x2b9   : > { %s1432_s8 = sand.u32 1, %s2587_s18   ;;  %p2589_p13 = scmp.ne.s32.totalorder %s2588_s23, 0 }
 0x2ba   : > { %s1433_s10 = scalar_lea.sflag [#allocation6], %s1432_s8 }
 0x2bb   : > { %p1844_p1 = pnand %p1539_p6, %p2589_p13 }
 0x2bd   : > { %2106 = dma.done.wait (!%p1844_p1), %s1433_s10, 256  }
 0x2be   : > { %2108 = vsyncadd (!%p1844_p1), %s1433_s10, 4294967040  ;;  %s25_s29 = sadd.s32 1, %s2131_s29   ;;  %s2590_s19 = sld [smem:[#allocation25_spill]] }
 0x2bf   : > { %p22_p3 = scmp.ge.s32.totalorder %s25_s29, 4   ;;  %s2591_s30 = sld [smem:[#allocation23_spill]] }
 0x2c0   : > { %s2592_s24 = smov %s2115_s25  ;;  %s2593_s25 = smov %s2119_s26 }
 0x2c1   : > { %s2595_s27 = smov %s2127_s28  ;;  %24 = sbr.rel (!%p22_p3) target bundleno = 11 (0xb), region = 123 }
 0x2c4   : > { %s2594_s26 = smov %s2590_s19 }
 0x2c5   : > { %s2596_s28 = smov %s2591_s30 }
 0x2c8   :  { %1438 = vsyncpa [#allocation5], 1 }
 0x2c9   :  { %1440 = vsyncpa [#allocation5 + $0x1], 1 }
 0x2ca   :  { %1441 = vsyncpa [#allocation8], 1 }
 0x2cb   :  { %1442 = vsyncpa [#allocation11], 1 }
 0x2cc   :  { %1443 = vsyncpa [#allocation6], 1 }
 0x2cd   :  { %1445 = vsyncpa [#allocation6 + $0x1], 1 }

</bundles_post_ra>
